<compile_context>
chip_gen: v7x
topology: tpu7x:2x2x1
jax: 0.10.0
libtpu: 0.0.40
codegen_flags: <defaults>
</compile_context>

<pallas_src>
import functools

import jax
import jax.numpy as jnp
from jax import lax
from jax.experimental import pallas as pl
from jax.experimental.pallas import tpu as pltpu

# Module constants (from Small_LM.py)
N_EMBED = 32
BLOCK_SIZE = 8           # max sequence length (causal tril buffer size)
NUM_HEADS = 4
HEAD_SIZE = 8            # NUM_HEADS * HEAD_SIZE == N_EMBED


def _mha_fused_kernel(x_ref, w_ref, o_ref, *, B, T, H, hs):
    """Whole multi-head attention in one invocation.

    x_ref : (B*T, D)        flattened input
    w_ref : (D, 3*H*hs)     fused projection weights, columns = [K_all|Q_all|V_all]
    o_ref : (B*T, H*hs)     concatenated-head output (torch.cat(dim=-1) layout)
    """
    x = x_ref[...]                   # (B*T, D)
    w = w_ref[...]                   # (D, 3*H*hs)
    D = x.shape[1]

    # One fused projection matmul for K/Q/V of every head.
    qkv = jnp.dot(x, w, preferred_element_type=jnp.float32)   # (B*T, 3*H*hs)

    k_off, q_off, v_off = 0, H * hs, 2 * H * hs

    # NOTE: the PyTorch module scales by embedding_dim ** -0.5 (NOT head_size).
    scale = jnp.float32(D ** -0.5)

    # Causal (lower-triangular) mask for a (T, T) score block, shared by all
    # (batch, head) pairs.
    row = lax.broadcasted_iota(jnp.int32, (T, T), 0)
    col = lax.broadcasted_iota(jnp.int32, (T, T), 1)
    causal = col <= row

    batch_outs = []
    for b in range(B):                       # statically unrolled (B=2)
        rows = slice(b * T, (b + 1) * T)
        head_outs = []
        for h in range(H):                   # statically unrolled (H=4)
            k = qkv[rows, k_off + h * hs:k_off + (h + 1) * hs]   # (T, hs)
            q = qkv[rows, q_off + h * hs:q_off + (h + 1) * hs]   # (T, hs)
            v = qkv[rows, v_off + h * hs:v_off + (h + 1) * hs]   # (T, hs)

            # q @ k^T without materializing a transpose (contract hs axes).
            s = lax.dot_general(q, k, (((1,), (1,)), ((), ())),
                                preferred_element_type=jnp.float32) * scale
            s = jnp.where(causal, s, -jnp.inf)   # every causal row has >=1 live entry

            # Stable softmax along the last axis.
            s_max = jnp.max(s, axis=-1, keepdims=True)
            p = jnp.exp(s - s_max)
            denom = jnp.sum(p, axis=-1, keepdims=True)
            r = pl.reciprocal(denom, approx=True)     # EUP slot, nearly free
            r = r * (2.0 - denom * r)                 # one Newton step -> ~f32 exact
            p = p * r

            head_outs.append(jnp.dot(p, v, preferred_element_type=jnp.float32))

        batch_outs.append(jnp.concatenate(head_outs, axis=-1))   # (T, H*hs)

    # Single lane-dense store of the full output slab.
    o_ref[...] = jnp.concatenate(batch_outs, axis=0).astype(o_ref.dtype)


def multi_head_attention(x, wk, wq, wv):
    """x: (B, T, D); wk/wq/wv: (H, D, hs) (already x @ W layout).

    Returns (B, T, H*hs), heads concatenated in order (== torch.cat(dim=-1)).
    """
    B, T, D = x.shape
    H, _, hs = wk.shape

    x2d = x.reshape(B * T, D)

    def flat(wh):  # (H, D, hs) -> (D, H*hs), head-major columns
        return jnp.transpose(wh, (1, 0, 2)).reshape(D, H * hs)

    # Fused weight: columns = [K heads | Q heads | V heads]  -> (D, 3*H*hs)
    w_fused = jnp.concatenate([flat(wk), flat(wq), flat(wv)], axis=-1)

    kernel = functools.partial(_mha_fused_kernel, B=B, T=T, H=H, hs=hs)

    out2d = pl.pallas_call(
        kernel,
        out_shape=jax.ShapeDtypeStruct((B * T, H * hs), jnp.float32),
        grid=(1,),  # single invocation: everything fits in VMEM
        in_specs=[
            pl.BlockSpec((B * T, D), lambda i: (0, 0)),
            pl.BlockSpec((D, 3 * H * hs), lambda i: (0, 0)),
        ],
        out_specs=pl.BlockSpec((B * T, H * hs), lambda i: (0, 0)),
        compiler_params=pltpu.CompilerParams(
            dimension_semantics=("arbitrary",)),
    )(x2d, w_fused)

    # Contiguous (free) reshape only; no transpose needed.
    return out2d.reshape(B, T, H * hs)


def _reference(x, wk, wq, wv):
    """Pure-JAX reference mirroring the PyTorch forward."""
    B, T, D = x.shape
    outs = []
    for h in range(wk.shape[0]):
        k = x @ wk[h]
        q = x @ wq[h]
        v = x @ wv[h]
        w = (q @ jnp.swapaxes(k, -2, -1)) * (D ** -0.5)
        mask = jnp.tril(jnp.ones((T, T), dtype=bool))
        w = jnp.where(mask, w, -jnp.inf)
        w = jax.nn.softmax(w, axis=-1)
        outs.append(w @ v)
    return jnp.concatenate(outs, axis=-1)


if __name__ == "__main__":
    key = jax.random.PRNGKey(0)
    k_x, k_k, k_q, k_v = jax.random.split(key, 4)

    B, T = 2, BLOCK_SIZE  # small shapes consistent with the module
    x = jax.random.normal(k_x, (B, T, N_EMBED), dtype=jnp.float32)

    # Deterministic parameter init (stands in for nn.Linear weights, stored
    # transposed: (H, n_embed, head_size)).
    init_scale = 1.0 / (N_EMBED ** 0.5)
    wk = jax.random.normal(k_k, (NUM_HEADS, N_EMBED, HEAD_SIZE), jnp.float32) * init_scale
    wq = jax.random.normal(k_q, (NUM_HEADS, N_EMBED, HEAD_SIZE), jnp.float32) * init_scale
    wv = jax.random.normal(k_v, (NUM_HEADS, N_EMBED, HEAD_SIZE), jnp.float32) * init_scale

    mha = jax.jit(multi_head_attention)
    out = mha(x, wk, wq, wv)
    jax.block_until_ready(out)

    ref = _reference(x, wk, wq, wv)
    assert out.shape == (B, T, NUM_HEADS * HEAD_SIZE), out.shape
    assert jnp.allclose(out, ref, atol=1e-5, rtol=1e-5), "mismatch vs reference"

    print("KERNEL_OK")
</pallas_src>

<mosaic_0001>
module attributes {stable_mosaic.version = 11 : i64} {
  func.func @_mha_fused_kernel(%arg0: i32, %arg1: memref<16x32xf32, #tpu.memory_space<vmem>>, %arg2: memref<32x96xf32, #tpu.memory_space<vmem>>, %arg3: memref<16x32xf32, #tpu.memory_space<vmem>>) attributes {dimension_semantics = [#tpu.dimension_semantics<arbitrary>], iteration_bounds = array<i64: 1>, scalar_prefetch = 0 : i64, scratch_operands = 0 : i64, tpu.core_type = #tpu.core_type<tc>, window_params = [{pipeline_mode = #tpu.pipeline_mode<synchronous>, transform_indices = @transform_0, window_bounds = array<i64: 16, 32>}, {pipeline_mode = #tpu.pipeline_mode<synchronous>, transform_indices = @transform_1, window_bounds = array<i64: 32, 96>}, {pipeline_mode = #tpu.pipeline_mode<synchronous>, transform_indices = @transform_2, window_bounds = array<i64: 16, 32>}]} {
    %c0 = arith.constant 0 : index
    %c0_0 = arith.constant 0 : index
    %0 = vector.load %arg1[%c0, %c0_0] : memref<16x32xf32, #tpu.memory_space<vmem>>, vector<16x32xf32>
    %c0_1 = arith.constant 0 : index
    %c0_2 = arith.constant 0 : index
    %1 = vector.load %arg2[%c0_1, %c0_2] : memref<32x96xf32, #tpu.memory_space<vmem>>, vector<32x96xf32>
    %cst = arith.constant dense<0.000000e+00> : vector<16x96xf32>
    %2 = tpu.matmul %0, %1, %cst {dimension_numbers = #tpu.dot_dimension_numbers<[1], [0], [0], [1], [0, 0, 1, 1], [], []>} : vector<16x32xf32>, vector<32x96xf32>, vector<16x96xf32> -> vector<16x96xf32>
    %3 = tpu.iota {dimensions = array<i32: 0>} : vector<8x8xi32>
    %4 = tpu.iota {dimensions = array<i32: 1>} : vector<8x8xi32>
    %5 = arith.cmpi sle, %4, %3 : vector<8x8xi32>
    %6 = vector.extract_strided_slice %2 {offsets = [0, 0], sizes = [8, 8], strides = [1, 1]} : vector<16x96xf32> to vector<8x8xf32>
    %7 = vector.extract_strided_slice %2 {offsets = [0, 32], sizes = [8, 8], strides = [1, 1]} : vector<16x96xf32> to vector<8x8xf32>
    %8 = vector.extract_strided_slice %2 {offsets = [0, 64], sizes = [8, 8], strides = [1, 1]} : vector<16x96xf32> to vector<8x8xf32>
    %cst_3 = arith.constant dense<0.000000e+00> : vector<8x8xf32>
    %9 = tpu.matmul %7, %6, %cst_3 {dimension_numbers = #tpu.dot_dimension_numbers<[1], [1], [0], [0], [0, 0, 1, 0], [], []>} : vector<8x8xf32>, vector<8x8xf32>, vector<8x8xf32> -> vector<8x8xf32>
    %cst_4 = arith.constant 0.176776692 : f32
    %10 = vector.broadcast %cst_4 : f32 to vector<8x8xf32>
    %11 = arith.mulf %9, %10 : vector<8x8xf32>
    %cst_5 = arith.constant 0xFF800000 : f32
    %12 = vector.broadcast %cst_5 : f32 to vector<8x8xf32>
    %13 = arith.select %5, %11, %12 : vector<8x8xi1>, vector<8x8xf32>
    %cst_6 = arith.constant dense<0xFF800000> : vector<8xf32>
    %14 = vector.multi_reduction <maximumf>, %13, %cst_6 [1] : vector<8x8xf32> to vector<8xf32>
    %15 = vector.shape_cast %14 : vector<8xf32> to vector<8x1xf32>
    %16 = vector.broadcast %15 : vector<8x1xf32> to vector<8x8xf32>
    %17 = arith.subf %13, %16 : vector<8x8xf32>
    %18 = math.exp %17 : vector<8x8xf32>
    %cst_7 = arith.constant dense<0.000000e+00> : vector<8xf32>
    %19 = vector.multi_reduction <add>, %18, %cst_7 [1] : vector<8x8xf32> to vector<8xf32>
    %20 = vector.shape_cast %19 : vector<8xf32> to vector<8x1xf32>
    %21 = tpu.reciprocal %20 {approx = true} : vector<8x1xf32> -> vector<8x1xf32>
    %22 = arith.mulf %20, %21 : vector<8x1xf32>
    %cst_8 = arith.constant 2.000000e+00 : f32
    %23 = vector.broadcast %cst_8 : f32 to vector<8x1xf32>
    %24 = arith.subf %23, %22 : vector<8x1xf32>
    %25 = arith.mulf %21, %24 : vector<8x1xf32>
    %26 = vector.broadcast %25 : vector<8x1xf32> to vector<8x8xf32>
    %27 = arith.mulf %18, %26 : vector<8x8xf32>
    %cst_9 = arith.constant dense<0.000000e+00> : vector<8x8xf32>
    %28 = tpu.matmul %27, %8, %cst_9 {dimension_numbers = #tpu.dot_dimension_numbers<[1], [0], [0], [1], [0, 0, 1, 1], [], []>} : vector<8x8xf32>, vector<8x8xf32>, vector<8x8xf32> -> vector<8x8xf32>
    %29 = vector.extract_strided_slice %2 {offsets = [0, 8], sizes = [8, 8], strides = [1, 1]} : vector<16x96xf32> to vector<8x8xf32>
    %30 = vector.extract_strided_slice %2 {offsets = [0, 40], sizes = [8, 8], strides = [1, 1]} : vector<16x96xf32> to vector<8x8xf32>
    %31 = vector.extract_strided_slice %2 {offsets = [0, 72], sizes = [8, 8], strides = [1, 1]} : vector<16x96xf32> to vector<8x8xf32>
    %cst_10 = arith.constant dense<0.000000e+00> : vector<8x8xf32>
    %32 = tpu.matmul %30, %29, %cst_10 {dimension_numbers = #tpu.dot_dimension_numbers<[1], [1], [0], [0], [0, 0, 1, 0], [], []>} : vector<8x8xf32>, vector<8x8xf32>, vector<8x8xf32> -> vector<8x8xf32>
    %cst_11 = arith.constant 0.176776692 : f32
    %33 = vector.broadcast %cst_11 : f32 to vector<8x8xf32>
    %34 = arith.mulf %32, %33 : vector<8x8xf32>
    %cst_12 = arith.constant 0xFF800000 : f32
    %35 = vector.broadcast %cst_12 : f32 to vector<8x8xf32>
    %36 = arith.select %5, %34, %35 : vector<8x8xi1>, vector<8x8xf32>
    %cst_13 = arith.constant dense<0xFF800000> : vector<8xf32>
    %37 = vector.multi_reduction <maximumf>, %36, %cst_13 [1] : vector<8x8xf32> to vector<8xf32>
    %38 = vector.shape_cast %37 : vector<8xf32> to vector<8x1xf32>
    %39 = vector.broadcast %38 : vector<8x1xf32> to vector<8x8xf32>
    %40 = arith.subf %36, %39 : vector<8x8xf32>
    %41 = math.exp %40 : vector<8x8xf32>
    %cst_14 = arith.constant dense<0.000000e+00> : vector<8xf32>
    %42 = vector.multi_reduction <add>, %41, %cst_14 [1] : vector<8x8xf32> to vector<8xf32>
    %43 = vector.shape_cast %42 : vector<8xf32> to vector<8x1xf32>
    %44 = tpu.reciprocal %43 {approx = true} : vector<8x1xf32> -> vector<8x1xf32>
    %45 = arith.mulf %43, %44 : vector<8x1xf32>
    %cst_15 = arith.constant 2.000000e+00 : f32
    %46 = vector.broadcast %cst_15 : f32 to vector<8x1xf32>
    %47 = arith.subf %46, %45 : vector<8x1xf32>
    %48 = arith.mulf %44, %47 : vector<8x1xf32>
    %49 = vector.broadcast %48 : vector<8x1xf32> to vector<8x8xf32>
    %50 = arith.mulf %41, %49 : vector<8x8xf32>
    %cst_16 = arith.constant dense<0.000000e+00> : vector<8x8xf32>
    %51 = tpu.matmul %50, %31, %cst_16 {dimension_numbers = #tpu.dot_dimension_numbers<[1], [0], [0], [1], [0, 0, 1, 1], [], []>} : vector<8x8xf32>, vector<8x8xf32>, vector<8x8xf32> -> vector<8x8xf32>
    %52 = vector.extract_strided_slice %2 {offsets = [0, 16], sizes = [8, 8], strides = [1, 1]} : vector<16x96xf32> to vector<8x8xf32>
    %53 = vector.extract_strided_slice %2 {offsets = [0, 48], sizes = [8, 8], strides = [1, 1]} : vector<16x96xf32> to vector<8x8xf32>
    %54 = vector.extract_strided_slice %2 {offsets = [0, 80], sizes = [8, 8], strides = [1, 1]} : vector<16x96xf32> to vector<8x8xf32>
    %cst_17 = arith.constant dense<0.000000e+00> : vector<8x8xf32>
    %55 = tpu.matmul %53, %52, %cst_17 {dimension_numbers = #tpu.dot_dimension_numbers<[1], [1], [0], [0], [0, 0, 1, 0], [], []>} : vector<8x8xf32>, vector<8x8xf32>, vector<8x8xf32> -> vector<8x8xf32>
    %cst_18 = arith.constant 0.176776692 : f32
    %56 = vector.broadcast %cst_18 : f32 to vector<8x8xf32>
    %57 = arith.mulf %55, %56 : vector<8x8xf32>
    %cst_19 = arith.constant 0xFF800000 : f32
    %58 = vector.broadcast %cst_19 : f32 to vector<8x8xf32>
    %59 = arith.select %5, %57, %58 : vector<8x8xi1>, vector<8x8xf32>
    %cst_20 = arith.constant dense<0xFF800000> : vector<8xf32>
    %60 = vector.multi_reduction <maximumf>, %59, %cst_20 [1] : vector<8x8xf32> to vector<8xf32>
    %61 = vector.shape_cast %60 : vector<8xf32> to vector<8x1xf32>
    %62 = vector.broadcast %61 : vector<8x1xf32> to vector<8x8xf32>
    %63 = arith.subf %59, %62 : vector<8x8xf32>
    %64 = math.exp %63 : vector<8x8xf32>
    %cst_21 = arith.constant dense<0.000000e+00> : vector<8xf32>
    %65 = vector.multi_reduction <add>, %64, %cst_21 [1] : vector<8x8xf32> to vector<8xf32>
    %66 = vector.shape_cast %65 : vector<8xf32> to vector<8x1xf32>
    %67 = tpu.reciprocal %66 {approx = true} : vector<8x1xf32> -> vector<8x1xf32>
    %68 = arith.mulf %66, %67 : vector<8x1xf32>
    %cst_22 = arith.constant 2.000000e+00 : f32
    %69 = vector.broadcast %cst_22 : f32 to vector<8x1xf32>
    %70 = arith.subf %69, %68 : vector<8x1xf32>
    %71 = arith.mulf %67, %70 : vector<8x1xf32>
    %72 = vector.broadcast %71 : vector<8x1xf32> to vector<8x8xf32>
    %73 = arith.mulf %64, %72 : vector<8x8xf32>
    %cst_23 = arith.constant dense<0.000000e+00> : vector<8x8xf32>
    %74 = tpu.matmul %73, %54, %cst_23 {dimension_numbers = #tpu.dot_dimension_numbers<[1], [0], [0], [1], [0, 0, 1, 1], [], []>} : vector<8x8xf32>, vector<8x8xf32>, vector<8x8xf32> -> vector<8x8xf32>
    %75 = vector.extract_strided_slice %2 {offsets = [0, 24], sizes = [8, 8], strides = [1, 1]} : vector<16x96xf32> to vector<8x8xf32>
    %76 = vector.extract_strided_slice %2 {offsets = [0, 56], sizes = [8, 8], strides = [1, 1]} : vector<16x96xf32> to vector<8x8xf32>
    %77 = vector.extract_strided_slice %2 {offsets = [0, 88], sizes = [8, 8], strides = [1, 1]} : vector<16x96xf32> to vector<8x8xf32>
    %cst_24 = arith.constant dense<0.000000e+00> : vector<8x8xf32>
    %78 = tpu.matmul %76, %75, %cst_24 {dimension_numbers = #tpu.dot_dimension_numbers<[1], [1], [0], [0], [0, 0, 1, 0], [], []>} : vector<8x8xf32>, vector<8x8xf32>, vector<8x8xf32> -> vector<8x8xf32>
    %cst_25 = arith.constant 0.176776692 : f32
    %79 = vector.broadcast %cst_25 : f32 to vector<8x8xf32>
    %80 = arith.mulf %78, %79 : vector<8x8xf32>
    %cst_26 = arith.constant 0xFF800000 : f32
    %81 = vector.broadcast %cst_26 : f32 to vector<8x8xf32>
    %82 = arith.select %5, %80, %81 : vector<8x8xi1>, vector<8x8xf32>
    %cst_27 = arith.constant dense<0xFF800000> : vector<8xf32>
    %83 = vector.multi_reduction <maximumf>, %82, %cst_27 [1] : vector<8x8xf32> to vector<8xf32>
    %84 = vector.shape_cast %83 : vector<8xf32> to vector<8x1xf32>
    %85 = vector.broadcast %84 : vector<8x1xf32> to vector<8x8xf32>
    %86 = arith.subf %82, %85 : vector<8x8xf32>
    %87 = math.exp %86 : vector<8x8xf32>
    %cst_28 = arith.constant dense<0.000000e+00> : vector<8xf32>
    %88 = vector.multi_reduction <add>, %87, %cst_28 [1] : vector<8x8xf32> to vector<8xf32>
    %89 = vector.shape_cast %88 : vector<8xf32> to vector<8x1xf32>
    %90 = tpu.reciprocal %89 {approx = true} : vector<8x1xf32> -> vector<8x1xf32>
    %91 = arith.mulf %89, %90 : vector<8x1xf32>
    %cst_29 = arith.constant 2.000000e+00 : f32
    %92 = vector.broadcast %cst_29 : f32 to vector<8x1xf32>
    %93 = arith.subf %92, %91 : vector<8x1xf32>
    %94 = arith.mulf %90, %93 : vector<8x1xf32>
    %95 = vector.broadcast %94 : vector<8x1xf32> to vector<8x8xf32>
    %96 = arith.mulf %87, %95 : vector<8x8xf32>
    %cst_30 = arith.constant dense<0.000000e+00> : vector<8x8xf32>
    %97 = tpu.matmul %96, %77, %cst_30 {dimension_numbers = #tpu.dot_dimension_numbers<[1], [0], [0], [1], [0, 0, 1, 1], [], []>} : vector<8x8xf32>, vector<8x8xf32>, vector<8x8xf32> -> vector<8x8xf32>
    %98 = tpu.concatenate %28, %51, %74, %97 in 1 : vector<8x8xf32>, vector<8x8xf32>, vector<8x8xf32>, vector<8x8xf32> -> vector<8x32xf32>
    %99 = vector.extract_strided_slice %2 {offsets = [8, 0], sizes = [8, 8], strides = [1, 1]} : vector<16x96xf32> to vector<8x8xf32>
    %100 = vector.extract_strided_slice %2 {offsets = [8, 32], sizes = [8, 8], strides = [1, 1]} : vector<16x96xf32> to vector<8x8xf32>
    %101 = vector.extract_strided_slice %2 {offsets = [8, 64], sizes = [8, 8], strides = [1, 1]} : vector<16x96xf32> to vector<8x8xf32>
    %cst_31 = arith.constant dense<0.000000e+00> : vector<8x8xf32>
    %102 = tpu.matmul %100, %99, %cst_31 {dimension_numbers = #tpu.dot_dimension_numbers<[1], [1], [0], [0], [0, 0, 1, 0], [], []>} : vector<8x8xf32>, vector<8x8xf32>, vector<8x8xf32> -> vector<8x8xf32>
    %cst_32 = arith.constant 0.176776692 : f32
    %103 = vector.broadcast %cst_32 : f32 to vector<8x8xf32>
    %104 = arith.mulf %102, %103 : vector<8x8xf32>
    %cst_33 = arith.constant 0xFF800000 : f32
    %105 = vector.broadcast %cst_33 : f32 to vector<8x8xf32>
    %106 = arith.select %5, %104, %105 : vector<8x8xi1>, vector<8x8xf32>
    %cst_34 = arith.constant dense<0xFF800000> : vector<8xf32>
    %107 = vector.multi_reduction <maximumf>, %106, %cst_34 [1] : vector<8x8xf32> to vector<8xf32>
    %108 = vector.shape_cast %107 : vector<8xf32> to vector<8x1xf32>
    %109 = vector.broadcast %108 : vector<8x1xf32> to vector<8x8xf32>
    %110 = arith.subf %106, %109 : vector<8x8xf32>
    %111 = math.exp %110 : vector<8x8xf32>
    %cst_35 = arith.constant dense<0.000000e+00> : vector<8xf32>
    %112 = vector.multi_reduction <add>, %111, %cst_35 [1] : vector<8x8xf32> to vector<8xf32>
    %113 = vector.shape_cast %112 : vector<8xf32> to vector<8x1xf32>
    %114 = tpu.reciprocal %113 {approx = true} : vector<8x1xf32> -> vector<8x1xf32>
    %115 = arith.mulf %113, %114 : vector<8x1xf32>
    %cst_36 = arith.constant 2.000000e+00 : f32
    %116 = vector.broadcast %cst_36 : f32 to vector<8x1xf32>
    %117 = arith.subf %116, %115 : vector<8x1xf32>
    %118 = arith.mulf %114, %117 : vector<8x1xf32>
    %119 = vector.broadcast %118 : vector<8x1xf32> to vector<8x8xf32>
    %120 = arith.mulf %111, %119 : vector<8x8xf32>
    %cst_37 = arith.constant dense<0.000000e+00> : vector<8x8xf32>
    %121 = tpu.matmul %120, %101, %cst_37 {dimension_numbers = #tpu.dot_dimension_numbers<[1], [0], [0], [1], [0, 0, 1, 1], [], []>} : vector<8x8xf32>, vector<8x8xf32>, vector<8x8xf32> -> vector<8x8xf32>
    %122 = vector.extract_strided_slice %2 {offsets = [8, 8], sizes = [8, 8], strides = [1, 1]} : vector<16x96xf32> to vector<8x8xf32>
    %123 = vector.extract_strided_slice %2 {offsets = [8, 40], sizes = [8, 8], strides = [1, 1]} : vector<16x96xf32> to vector<8x8xf32>
    %124 = vector.extract_strided_slice %2 {offsets = [8, 72], sizes = [8, 8], strides = [1, 1]} : vector<16x96xf32> to vector<8x8xf32>
    %cst_38 = arith.constant dense<0.000000e+00> : vector<8x8xf32>
    %125 = tpu.matmul %123, %122, %cst_38 {dimension_numbers = #tpu.dot_dimension_numbers<[1], [1], [0], [0], [0, 0, 1, 0], [], []>} : vector<8x8xf32>, vector<8x8xf32>, vector<8x8xf32> -> vector<8x8xf32>
    %cst_39 = arith.constant 0.176776692 : f32
    %126 = vector.broadcast %cst_39 : f32 to vector<8x8xf32>
    %127 = arith.mulf %125, %126 : vector<8x8xf32>
    %cst_40 = arith.constant 0xFF800000 : f32
    %128 = vector.broadcast %cst_40 : f32 to vector<8x8xf32>
    %129 = arith.select %5, %127, %128 : vector<8x8xi1>, vector<8x8xf32>
    %cst_41 = arith.constant dense<0xFF800000> : vector<8xf32>
    %130 = vector.multi_reduction <maximumf>, %129, %cst_41 [1] : vector<8x8xf32> to vector<8xf32>
    %131 = vector.shape_cast %130 : vector<8xf32> to vector<8x1xf32>
    %132 = vector.broadcast %131 : vector<8x1xf32> to vector<8x8xf32>
    %133 = arith.subf %129, %132 : vector<8x8xf32>
    %134 = math.exp %133 : vector<8x8xf32>
    %cst_42 = arith.constant dense<0.000000e+00> : vector<8xf32>
    %135 = vector.multi_reduction <add>, %134, %cst_42 [1] : vector<8x8xf32> to vector<8xf32>
    %136 = vector.shape_cast %135 : vector<8xf32> to vector<8x1xf32>
    %137 = tpu.reciprocal %136 {approx = true} : vector<8x1xf32> -> vector<8x1xf32>
    %138 = arith.mulf %136, %137 : vector<8x1xf32>
    %cst_43 = arith.constant 2.000000e+00 : f32
    %139 = vector.broadcast %cst_43 : f32 to vector<8x1xf32>
    %140 = arith.subf %139, %138 : vector<8x1xf32>
    %141 = arith.mulf %137, %140 : vector<8x1xf32>
    %142 = vector.broadcast %141 : vector<8x1xf32> to vector<8x8xf32>
    %143 = arith.mulf %134, %142 : vector<8x8xf32>
    %cst_44 = arith.constant dense<0.000000e+00> : vector<8x8xf32>
    %144 = tpu.matmul %143, %124, %cst_44 {dimension_numbers = #tpu.dot_dimension_numbers<[1], [0], [0], [1], [0, 0, 1, 1], [], []>} : vector<8x8xf32>, vector<8x8xf32>, vector<8x8xf32> -> vector<8x8xf32>
    %145 = vector.extract_strided_slice %2 {offsets = [8, 16], sizes = [8, 8], strides = [1, 1]} : vector<16x96xf32> to vector<8x8xf32>
    %146 = vector.extract_strided_slice %2 {offsets = [8, 48], sizes = [8, 8], strides = [1, 1]} : vector<16x96xf32> to vector<8x8xf32>
    %147 = vector.extract_strided_slice %2 {offsets = [8, 80], sizes = [8, 8], strides = [1, 1]} : vector<16x96xf32> to vector<8x8xf32>
    %cst_45 = arith.constant dense<0.000000e+00> : vector<8x8xf32>
    %148 = tpu.matmul %146, %145, %cst_45 {dimension_numbers = #tpu.dot_dimension_numbers<[1], [1], [0], [0], [0, 0, 1, 0], [], []>} : vector<8x8xf32>, vector<8x8xf32>, vector<8x8xf32> -> vector<8x8xf32>
    %cst_46 = arith.constant 0.176776692 : f32
    %149 = vector.broadcast %cst_46 : f32 to vector<8x8xf32>
    %150 = arith.mulf %148, %149 : vector<8x8xf32>
    %cst_47 = arith.constant 0xFF800000 : f32
    %151 = vector.broadcast %cst_47 : f32 to vector<8x8xf32>
    %152 = arith.select %5, %150, %151 : vector<8x8xi1>, vector<8x8xf32>
    %cst_48 = arith.constant dense<0xFF800000> : vector<8xf32>
    %153 = vector.multi_reduction <maximumf>, %152, %cst_48 [1] : vector<8x8xf32> to vector<8xf32>
    %154 = vector.shape_cast %153 : vector<8xf32> to vector<8x1xf32>
    %155 = vector.broadcast %154 : vector<8x1xf32> to vector<8x8xf32>
    %156 = arith.subf %152, %155 : vector<8x8xf32>
    %157 = math.exp %156 : vector<8x8xf32>
    %cst_49 = arith.constant dense<0.000000e+00> : vector<8xf32>
    %158 = vector.multi_reduction <add>, %157, %cst_49 [1] : vector<8x8xf32> to vector<8xf32>
    %159 = vector.shape_cast %158 : vector<8xf32> to vector<8x1xf32>
    %160 = tpu.reciprocal %159 {approx = true} : vector<8x1xf32> -> vector<8x1xf32>
    %161 = arith.mulf %159, %160 : vector<8x1xf32>
    %cst_50 = arith.constant 2.000000e+00 : f32
    %162 = vector.broadcast %cst_50 : f32 to vector<8x1xf32>
    %163 = arith.subf %162, %161 : vector<8x1xf32>
    %164 = arith.mulf %160, %163 : vector<8x1xf32>
    %165 = vector.broadcast %164 : vector<8x1xf32> to vector<8x8xf32>
    %166 = arith.mulf %157, %165 : vector<8x8xf32>
    %cst_51 = arith.constant dense<0.000000e+00> : vector<8x8xf32>
    %167 = tpu.matmul %166, %147, %cst_51 {dimension_numbers = #tpu.dot_dimension_numbers<[1], [0], [0], [1], [0, 0, 1, 1], [], []>} : vector<8x8xf32>, vector<8x8xf32>, vector<8x8xf32> -> vector<8x8xf32>
    %168 = vector.extract_strided_slice %2 {offsets = [8, 24], sizes = [8, 8], strides = [1, 1]} : vector<16x96xf32> to vector<8x8xf32>
    %169 = vector.extract_strided_slice %2 {offsets = [8, 56], sizes = [8, 8], strides = [1, 1]} : vector<16x96xf32> to vector<8x8xf32>
    %170 = vector.extract_strided_slice %2 {offsets = [8, 88], sizes = [8, 8], strides = [1, 1]} : vector<16x96xf32> to vector<8x8xf32>
    %cst_52 = arith.constant dense<0.000000e+00> : vector<8x8xf32>
    %171 = tpu.matmul %169, %168, %cst_52 {dimension_numbers = #tpu.dot_dimension_numbers<[1], [1], [0], [0], [0, 0, 1, 0], [], []>} : vector<8x8xf32>, vector<8x8xf32>, vector<8x8xf32> -> vector<8x8xf32>
    %cst_53 = arith.constant 0.176776692 : f32
    %172 = vector.broadcast %cst_53 : f32 to vector<8x8xf32>
    %173 = arith.mulf %171, %172 : vector<8x8xf32>
    %cst_54 = arith.constant 0xFF800000 : f32
    %174 = vector.broadcast %cst_54 : f32 to vector<8x8xf32>
    %175 = arith.select %5, %173, %174 : vector<8x8xi1>, vector<8x8xf32>
    %cst_55 = arith.constant dense<0xFF800000> : vector<8xf32>
    %176 = vector.multi_reduction <maximumf>, %175, %cst_55 [1] : vector<8x8xf32> to vector<8xf32>
    %177 = vector.shape_cast %176 : vector<8xf32> to vector<8x1xf32>
    %178 = vector.broadcast %177 : vector<8x1xf32> to vector<8x8xf32>
    %179 = arith.subf %175, %178 : vector<8x8xf32>
    %180 = math.exp %179 : vector<8x8xf32>
    %cst_56 = arith.constant dense<0.000000e+00> : vector<8xf32>
    %181 = vector.multi_reduction <add>, %180, %cst_56 [1] : vector<8x8xf32> to vector<8xf32>
    %182 = vector.shape_cast %181 : vector<8xf32> to vector<8x1xf32>
    %183 = tpu.reciprocal %182 {approx = true} : vector<8x1xf32> -> vector<8x1xf32>
    %184 = arith.mulf %182, %183 : vector<8x1xf32>
    %cst_57 = arith.constant 2.000000e+00 : f32
    %185 = vector.broadcast %cst_57 : f32 to vector<8x1xf32>
    %186 = arith.subf %185, %184 : vector<8x1xf32>
    %187 = arith.mulf %183, %186 : vector<8x1xf32>
    %188 = vector.broadcast %187 : vector<8x1xf32> to vector<8x8xf32>
    %189 = arith.mulf %180, %188 : vector<8x8xf32>
    %cst_58 = arith.constant dense<0.000000e+00> : vector<8x8xf32>
    %190 = tpu.matmul %189, %170, %cst_58 {dimension_numbers = #tpu.dot_dimension_numbers<[1], [0], [0], [1], [0, 0, 1, 1], [], []>} : vector<8x8xf32>, vector<8x8xf32>, vector<8x8xf32> -> vector<8x8xf32>
    %191 = tpu.concatenate %121, %144, %167, %190 in 1 : vector<8x8xf32>, vector<8x8xf32>, vector<8x8xf32>, vector<8x8xf32> -> vector<8x32xf32>
    %192 = tpu.concatenate %98, %191 in 0 : vector<8x32xf32>, vector<8x32xf32> -> vector<16x32xf32>
    %c0_59 = arith.constant 0 : index
    %c0_60 = arith.constant 0 : index
    %193 = vector.load %arg3[%c0_59, %c0_60] : memref<16x32xf32, #tpu.memory_space<vmem>>, vector<16x32xf32>
    tpu.vector_store %arg3[%c0_59, %c0_60], %192 {strides = array<i32>} : memref<16x32xf32, #tpu.memory_space<vmem>>, vector<16x32xf32>,
    return
  }
  func.func @transform_0(%arg0: i32) -> (i32, i32) {
    %c0_i32 = arith.constant 0 : i32
    %c0_i32_0 = arith.constant 0 : i32
    %c0_i32_1 = arith.constant 0 : i32
    return %c0_i32, %c0_i32_0 : i32, i32
  }
  func.func @transform_1(%arg0: i32) -> (i32, i32) {
    %c0_i32 = arith.constant 0 : i32
    %c0_i32_0 = arith.constant 0 : i32
    %c0_i32_1 = arith.constant 0 : i32
    return %c0_i32, %c0_i32_0 : i32, i32
  }
  func.func @transform_2(%arg0: i32) -> (i32, i32) {
    %c0_i32 = arith.constant 0 : i32
    %c0_i32_0 = arith.constant 0 : i32
    %c0_i32_1 = arith.constant 0 : i32
    return %c0_i32, %c0_i32_0 : i32, i32
  }
}

</mosaic_0001>

<bundles_post_ra>
// kernel: multi_head_attention.1
= control target key start
LH: loop header
LB: loop body
LE: loop exit
PB: predicated region body
PF: predicated region fallthrough
CT: control target
= control target key end

     0   :  { %vm18_vm0 = vcmask 261120   ;;  %s1999_s0 = inlined_call_operand.vmem [shape: f32[16,32], index: 0, kind: input, shape index: {}]   ;;  %s2000_s1 = inlined_call_operand.vmem [shape: f32[32,96], index: 1, kind: input, shape index: {}]   ;;  %s2001_s2 = inlined_call_operand.hbm [shape: f32[16,32], index: 2, kind: output, shape index: {}]  }
   0x1   :  { %v14_v0 = vld [vmem:[%s2000_s1] sm:$0xff]  ;;  %v15_v1 = vld [vmem:[%s2000_s1 + $0x8] sm:$0xff]  ;;  %v16_v2 = vld [vmem:[%s2000_s1 + $0x10] sm:$0xff] }
   0x2   :  { %v1669_v3 = vpack.c.bf16 %v15_v1, %v14_v0  ;;  %v17_v4 = vld [vmem:[%s2000_s1 + $0x18] sm:$0xff]  ;;  %v12_v5 = vld [vmem:[%s1999_s0] sm:$0xff] }
   0x3   :  { %v1673_v6 = vpack.c.bf16 %v17_v4, %v16_v2  ;;  %1586 = vmatprep.mubr.msk.f32.mxu0 %vm18_vm0, %v12_v5 }
   0x4   :  { %7 = vsyncpa [#allocation3], 0  ;;  %1670 = vmatprep.subr.bf16.mxu0 %v1669_v3  ;;  %v13_v7 = vld [vmem:[%s1999_s0 + $0x8] sm:$0xff]  ;;  %v1751_v8 = vmov 0.0   ;;  %vm1752_vm1 = vmmov 0   ;;  %vm108_vm2 = vcmask 64512   ;;  %v100_v26 = vlaneseq }
   0x5   :  { %1672 = vmatpush3.bf16.msra.mxu0 %v1669_v3  ;;  %1589 = vmatprep.subr.mxu1 %v1751_v8  ;;  %s1753_s0 = smov 88   ;;  %s1754_s1 = smov 96   ;;  %vm798_vm4 = vcmask 130048   ;;  %vm800_vm5 = vcmask 195584  }
   0x6   :  { %1674 = vmatprep.subr.bf16.mxu0 %v1673_v6  ;;  %1591 = vmatprep.mubr.msk.f32.mxu1 %vm1752_vm1, %v1751_v8  ;;  %s1755_s21 = smov 112   ;;  %s1756_s22 = smov 120   ;;  %v101_v27 = vshrl.u32 %v100_v26, 7  ;;  %v103_v28 = vand.u32 127, %v100_v26 }
   0x7   :  { %s1757_s23 = smov 104   ;;  %s1758_s24 = smov 80  }
   0x8   :  { %s1759_s25 = smov 72   ;;  %s1760_s26 = smov 64   ;;  %vm1870_vm3 = vcmp.le.s32.totalorder %v103_v28, %v101_v27 }
   0x9   :  { %1676 = vmatpush3.bf16.msra.mxu0 %v1673_v6  ;;  %s1761_s27 = smov 48   ;;  %s1762_s28 = smov 40  }
   0xa   :  { %1599 = vmatprep.subr.mxu0 %v1751_v8  ;;  %s1763_s29 = smov 56   ;;  %s1764_s30 = smov 8  }
   0xb   :  { %s1765_s3 = smov 16   ;;  %s1766_s4 = smov 24  }
   0xc   :  { %1587 = vmatmul.mubr.msk.f32.vlgmr.msra.gmra.mrb[0].mxu0 %vm18_vm0, %v13_v7  ;;  %s1767_s5 = smov [#allocation2]  }
   0xd   :  { %1601 = vmatprep.mubr.msk.f32.mxu0 %vm1752_vm1, %v1751_v8  ;;  %s1503_s6 = sshll.u32 %s1767_s5, 4  ;;  %s1504_s6 = int_to_ptr.vmem [resolvable:$true] %s1503_s6 }
   0xe   :  { %s1727_s7 = scalar_lea.vmem %s1504_s6, 256  ;;  %p1732_p1 = scmp.lt.s32.totalorder %s1504_s6, %s1504_s6 }
   0xf   :  { %p1728_p0 = scmp.ne.s32.totalorder %s1504_s6, %s1727_s7  ;;  %p1733_p2 = scmp.lt.s32.totalorder %s1727_s7, %s1727_s7 }
  0x11   :  { %p1734_p3 = por %p1733_p2, %p1732_p1 }
  0x13   :  { %p1735_p4 = pnand %p1734_p3, %p1728_p0 }
  0xdf   :  { %v1810_v9 = vpop.f32.mrb[0].mxu0 }
  0xe0   :  { %v1812_v10 = vpop.f32.mrb[1].mxu0 }
  0xe1   :  { %275 = vrot.lane.b32.xlu1 %v1812_v10, %s1753_s0  ;;  %106 = vrot.lane.b32.xlu0 %v1812_v10, %s1754_s1 }
  0xe2   :  { %1590 = vmatpush3.xpose.msk.msra.mxu1 %vm108_vm2, %v1812_v10 }
  0xe3   :  { %1594 = vmatprep.subr.mxu1 %v1751_v8 }
  0xe5   :  { %447 = vrot.lane.b32.xlu1 %v1812_v10, %s1755_s21  ;;  %277 = vrot.lane.b32.xlu0 %v1812_v10, %s1756_s22 }
  0xe9   :  { %617 = vrot.lane.b32.xlu1 %v1812_v10, %s1757_s23  ;;  %445 = vrot.lane.b32.xlu0 %v1812_v10, %s1758_s24 }
  0xed   :  { %803 = vrot.lane.b32.xlu1 %v1810_v9, %s1754_s1  ;;  %615 = vrot.lane.b32.xlu0 %v1812_v10, %s1759_s25 }
  0xf1   :  { %971 = vrot.lane.b32.xlu1 %v1810_v9, %s1753_s0  ;;  %973 = vrot.lane.b32.xlu0 %v1810_v9, %s1756_s22 }
  0xf5   :  { %1141 = vrot.lane.b32.xlu1 %v1810_v9, %s1758_s24  ;;  %1143 = vrot.lane.b32.xlu0 %v1810_v9, %s1755_s21 }
  0xf9   :  { %1311 = vrot.lane.b32.xlu1 %v1810_v9, %s1759_s25  ;;  %1313 = vrot.lane.b32.xlu0 %v1810_v9, %s1757_s23 }
  0xfd   :  { %199 = vrot.lane.b32.xlu1 %v1812_v10, %s1760_s26 }
 0x153   :  { %v276_v11 = vpop.permute.xlu1 %275  ;;  %v107_v12 = vpop.permute.xlu0 %106 }
 0x154   :  { %1592 = vmatmul.mubr.msk.f32.vlgmr.msra.gmra.mrb[0].mxu1 %vm108_vm2, %v107_v12 }
 0x155   :  { %1596 = vmatprep.mubr.msk.f32.mxu1 %vm1752_vm1, %v1751_v8 }
 0x157   :  { %v448_v13 = vpop.permute.xlu1 %447  ;;  %v278_v14 = vpop.permute.xlu0 %277 }
 0x158   :  { %1600 = vmatpush3.xpose.msk.msra.mxu0 %vm108_vm2, %v278_v14 }
 0x159   :  { %1609 = vmatprep.subr.mxu0 %v1751_v8 }
 0x15b   :  { %v618_v15 = vpop.permute.xlu1 %617  ;;  %1602 = vmatmul.mubr.msk.f32.vlgmr.msra.gmra.mrb[2].mxu0 %vm108_vm2, %v276_v11  ;;  %v446_v16 = vpop.permute.xlu0 %445 }
 0x15c   :  { %1610 = vmatpush3.xpose.msk.msra.mxu0 %vm108_vm2, %v448_v13  ;;  %1611 = vmatprep.mubr.msk.f32.mxu0 %vm1752_vm1, %v1751_v8 }
 0x15d   :  { %1619 = vmatprep.subr.mxu0 %v1751_v8 }
 0x15f   :  { %v804_v17 = vpop.permute.xlu1 %803  ;;  %1612 = vmatmul.mubr.msk.f32.vlgmr.msra.gmra.mrb[4].mxu0 %vm108_vm2, %v446_v16  ;;  %v616_v18 = vpop.permute.xlu0 %615 }
 0x160   :  { %1620 = vmatpush3.xpose.msk.msra.mxu0 %vm108_vm2, %v618_v15  ;;  %1621 = vmatprep.mubr.msk.f32.mxu0 %vm1752_vm1, %v1751_v8 }
 0x161   :  { %1629 = vmatprep.subr.mxu0 %v1751_v8 }
 0x163   :  { %v972_v19 = vpop.permute.xlu1 %971  ;;  %1622 = vmatmul.mubr.msk.f32.vlgmr.msra.gmra.mrb[6].mxu0 %vm108_vm2, %v616_v18  ;;  %v974_v20 = vpop.permute.xlu0 %973 }
 0x164   :  { %1630 = vmatpush3.xpose.msk.msra.mxu0 %vm108_vm2, %v1810_v9  ;;  %1631 = vmatprep.mubr.msk.f32.mxu0 %vm1752_vm1, %v1751_v8 }
 0x165   :  { %1639 = vmatprep.subr.mxu0 %v1751_v8 }
 0x167   :  { %v1142_v21 = vpop.permute.xlu1 %1141  ;;  %1632 = vmatmul.mubr.msk.f32.vlgmr.msra.gmra.mrb[8].mxu0 %vm108_vm2, %v804_v17  ;;  %v1144_v22 = vpop.permute.xlu0 %1143 }
 0x168   :  { %1640 = vmatpush3.xpose.msk.msra.mxu0 %vm108_vm2, %v974_v20  ;;  %1641 = vmatprep.mubr.msk.f32.mxu0 %vm1752_vm1, %v1751_v8 }
 0x169   :  { %1649 = vmatprep.subr.mxu0 %v1751_v8 }
 0x16b   :  { %v1312_v23 = vpop.permute.xlu1 %1311  ;;  %1642 = vmatmul.mubr.msk.f32.vlgmr.msra.gmra.mrb[10].mxu0 %vm108_vm2, %v972_v19  ;;  %v1314_v24 = vpop.permute.xlu0 %1313 }
 0x16c   :  { %1650 = vmatpush3.xpose.msk.msra.mxu0 %vm108_vm2, %v1144_v22  ;;  %1651 = vmatprep.mubr.msk.f32.mxu0 %vm1752_vm1, %v1751_v8 }
 0x16d   :  { %1659 = vmatprep.subr.mxu0 %v1751_v8 }
 0x16f   :  { %v200_v25 = vpop.permute.xlu1 %199  ;;  %1652 = vmatmul.mubr.msk.f32.vlgmr.msra.gmra.mrb[12].mxu0 %vm108_vm2, %v1142_v21 }
 0x170   :  { %1595 = vmatpush3.msra.mxu1 %v200_v25  ;;  %1660 = vmatpush3.xpose.msk.msra.mxu0 %vm108_vm2, %v1314_v24 }
 0x171   :  { %1661 = vmatprep.mubr.msk.f32.mxu0 %vm1752_vm1, %v1751_v8  ;;  %1604 = vmatprep.subr.mxu1 %v1751_v8 }
 0x173   :  { %1662 = vmatmul.mubr.msk.f32.vlgmr.msra.gmra.mrb[14].mxu0 %vm108_vm2, %v1312_v23 }
 0x227   :  { %v179_v29 = vpop.f32.mrb[0].mxu1 }
 0x228   :  { %v183_v31 = vmul.f32 0.17677669, %v179_v29  ;;  %v1593_v32 = vpop.f32.mrb[1].mxu1 }
 0x22a   :  { %v184_v33 = vsel %vm1870_vm3, %v183_v31, -inf }
 0x22b   :  { %v185_v34 = vsel %vm108_vm2, %v184_v33, -inf }
 0x22c   :  { %186 = vmax.xlane.f32.xlu0 %v185_v34 }
 0x22e   :  { %v349_v35 = vpop.f32.mrb[2].mxu0 }
 0x22f   :  { %v353_v36 = vmul.f32 0.17677669, %v349_v35  ;;  %v1603_v37 = vpop.f32.mrb[3].mxu0 }
 0x231   :  { %v354_v38 = vsel %vm1870_vm3, %v353_v36, -inf }
 0x232   :  { %v519_v39 = vpop.f32.mrb[4].mxu0  ;;  %v355_v40 = vsel %vm108_vm2, %v354_v38, -inf }
 0x233   :  { %v523_v41 = vmul.f32 0.17677669, %v519_v39  ;;  %356 = vmax.xlane.f32.xlu1 %v355_v40  ;;  %v1613_v42 = vpop.f32.mrb[5].mxu0 }
 0x235   :  { %v524_v43 = vsel %vm1870_vm3, %v523_v41, -inf }
 0x236   :  { %v689_v44 = vpop.f32.mrb[6].mxu0  ;;  %v525_v45 = vsel %vm108_vm2, %v524_v43, -inf }
 0x237   :  { %v693_v46 = vmul.f32 0.17677669, %v689_v44  ;;  %v1623_v47 = vpop.f32.mrb[7].mxu0  ;;  %526 = vmax.xlane.f32.xlu0 %v525_v45 }
 0x239   :  { %v694_v48 = vsel %vm1870_vm3, %v693_v46, -inf }
 0x23a   :  { %v875_v49 = vpop.f32.mrb[8].mxu0  ;;  %v695_v50 = vsel %vm108_vm2, %v694_v48, -inf }
 0x23b   :  { %v879_v51 = vmul.f32 0.17677669, %v875_v49  ;;  %v1633_v52 = vpop.f32.mrb[9].mxu0  ;;  %696 = vmax.xlane.f32.xlu0 %v695_v50 }
 0x23d   :  { %v880_v53 = vsel %vm1870_vm3, %v879_v51, -inf }
 0x23e   :  { %v1045_v54 = vpop.f32.mrb[10].mxu0  ;;  %v881_v55 = vsel %vm108_vm2, %v880_v53, -inf }
 0x23f   :  { %v1049_v56 = vmul.f32 0.17677669, %v1045_v54  ;;  %882 = vmax.xlane.f32.xlu1 %v881_v55  ;;  %v1643_v57 = vpop.f32.mrb[11].mxu0 }
 0x241   :  { %v1050_v58 = vsel %vm1870_vm3, %v1049_v56, -inf }
 0x242   :  { %v1215_v59 = vpop.f32.mrb[12].mxu0  ;;  %v1051_v60 = vsel %vm108_vm2, %v1050_v58, -inf }
 0x243   :  { %v1219_v61 = vmul.f32 0.17677669, %v1215_v59  ;;  %v1653_v62 = vpop.f32.mrb[13].mxu0  ;;  %1052 = vmax.xlane.f32.xlu0 %v1051_v60 }
 0x245   :  { %v1220_v63 = vsel %vm1870_vm3, %v1219_v61, -inf }
 0x246   :  { %v1385_v0 = vpop.f32.mrb[14].mxu0  ;;  %v1221_v1 = vsel %vm108_vm2, %v1220_v63, -inf }
 0x247   :  { %v1389_v2 = vmul.f32 0.17677669, %v1385_v0  ;;  %1222 = vmax.xlane.f32.xlu1 %v1221_v1  ;;  %v1663_v3 = vpop.f32.mrb[15].mxu0 }
 0x249   :  { %v1390_v4 = vsel %vm1870_vm3, %v1389_v2, -inf }
 0x24a   :  { %v1391_v5 = vsel %vm108_vm2, %v1390_v4, -inf }
 0x24b   :  { %1392 = vmax.xlane.f32.xlu0 %v1391_v5 }
 0x258   :  { %539 = vrot.lane.b32.xlu1 %v1812_v10, %s1761_s27 }
 0x25c   :  { %709 = vrot.lane.b32.xlu1 %v1812_v10, %s1762_s28 }
 0x261   :  { %369 = vrot.lane.b32.xlu0 %v1812_v10, %s1763_s29 }
 0x2b9   :  { %v187_v6 = vpop.xlane.xlu0 %186 }
 0x2ba   :  { %v188_v7 = vsub.f32 %v184_v33, %v187_v6 }
 0x2bc   :  { %v189_v11 = vmul.f32 1.442695, %v188_v7 }
 0x2be   :  { %1695 = vpow2.f32 %v189_v11 }
 0x2c0   :  { %v357_v12 = vpop.xlane.xlu1 %356 }
 0x2c1   :  { %v358_v13 = vsub.f32 %v354_v38, %v357_v12 }
 0x2c3   :  { %v359_v14 = vmul.f32 1.442695, %v358_v13 }
 0x2c4   :  { %v527_v15 = vpop.xlane.xlu0 %526 }
 0x2c5   :  { %1697 = vpow2.f32 %v359_v14  ;;  %v528_v16 = vsub.f32 %v524_v43, %v527_v15 }
 0x2c7   :  { %v529_v17 = vmul.f32 1.442695, %v528_v16 }
 0x2c8   :  { %v1904_v18 = vpop.eup %1695  ;;  %v697_v19 = vpop.xlane.xlu0 %696 }
 0x2c9   :  { %1699 = vpow2.f32 %v529_v17  ;;  %v698_v20 = vsub.f32 %v694_v48, %v697_v19  ;;  %v191_v21 = vsel %vm108_vm2, %v1904_v18, 0.0 }
 0x2ca   :  { %192 = vadd.xlane.f32.xlu1 %v191_v21 }
 0x2cb   :  { %v699_v10 = vmul.f32 1.442695, %v698_v20 }
 0x2cc   :  { %v883_v22 = vpop.xlane.xlu1 %882 }
 0x2cd   :  { %1701 = vpow2.f32 %v699_v10  ;;  %v884_v23 = vsub.f32 %v880_v53, %v883_v22 }
 0x2cf   :  { %v1908_v24 = vpop.eup %1697  ;;  %v885_v25 = vmul.f32 1.442695, %v884_v23 }
 0x2d0   :  { %v1053_v26 = vpop.xlane.xlu0 %1052  ;;  %v361_v27 = vsel %vm108_vm2, %v1908_v24, 0.0 }
 0x2d1   :  { %1703 = vpow2.f32 %v885_v25  ;;  %v1054_v28 = vsub.f32 %v1050_v58, %v1053_v26  ;;  %362 = vadd.xlane.f32.xlu0 %v361_v27 }
 0x2d3   :  { %v1912_v29 = vpop.eup %1699  ;;  %v1055_v30 = vmul.f32 1.442695, %v1054_v28 }
 0x2d4   :  { %v531_v31 = vsel %vm108_vm2, %v1912_v29, 0.0  ;;  %v1223_v38 = vpop.xlane.xlu1 %1222 }
 0x2d5   :  { %1705 = vpow2.f32 %v1055_v30  ;;  %532 = vadd.xlane.f32.xlu1 %v531_v31  ;;  %v1224_v39 = vsub.f32 %v1220_v63, %v1223_v38 }
 0x2d7   :  { %v1916_v32 = vpop.eup %1701  ;;  %v1225_v41 = vmul.f32 1.442695, %v1224_v39 }
 0x2d8   :  { %v701_v33 = vsel %vm108_vm2, %v1916_v32, 0.0  ;;  %v1393_v40 = vpop.xlane.xlu0 %1392  ;;  %v540_v48 = vpop.permute.xlu1 %539 }
 0x2d9   :  { %702 = vadd.xlane.f32.xlu0 %v701_v33  ;;  %v1394_v42 = vsub.f32 %v1390_v4, %v1393_v40  ;;  %1707 = vpow2.f32 %v1225_v41 }
 0x2db   :  { %v1920_v34 = vpop.eup %1703  ;;  %v1395_v43 = vmul.f32 1.442695, %v1394_v42 }
 0x2dc   :  { %v887_v35 = vsel %vm108_vm2, %v1920_v34, 0.0  ;;  %v710_v49 = vpop.permute.xlu1 %709  ;;  %v370_v51 = vpop.permute.xlu0 %369 }
 0x2dd   :  { %888 = vadd.xlane.f32.xlu1 %v887_v35  ;;  %1709 = vpow2.f32 %v1395_v43 }
 0x2df   :  { %v1924_v36 = vpop.eup %1705 }
 0x2e0   :  { %v1057_v37 = vsel %vm108_vm2, %v1924_v36, 0.0 }
 0x2e1   :  { %1058 = vadd.xlane.f32.xlu0 %v1057_v37 }
 0x2e3   :  { %v1932_v44 = vpop.eup %1707 }
 0x2e4   :  { %v1227_v45 = vsel %vm108_vm2, %v1932_v44, 0.0 }
 0x2e7   :  { %v1936_v46 = vpop.eup %1709 }
 0x2e8   :  { %v1397_v47 = vsel %vm108_vm2, %v1936_v46, 0.0 }
 0x2ee   :  { %1065 = vrot.lane.b32.xlu1 %v1810_v9, %s1763_s29 }
 0x2f7   :  { %895 = vrot.lane.b32.xlu0 %v1810_v9, %s1760_s26 }
 0x312   :  { %1228 = vadd.xlane.f32.xlu1 %v1227_v45 }
 0x316   :  { %1398 = vadd.xlane.f32.xlu0 %v1397_v47 }
 0x323   :  { %1405 = vrot.lane.b32.xlu1 %v1810_v9, %s1762_s28 }
 0x32c   :  { %1235 = vrot.lane.b32.xlu0 %v1810_v9, %s1761_s27 }
 0x357   :  { %v193_v50 = vpop.xlane.xlu1 %192 }
 0x358   :  { %1711 = vrcp.f32 %v193_v50 }
 0x35e   :  { %v363_v52 = vpop.xlane.xlu0 %362 }
 0x35f   :  { %1713 = vrcp.f32 %v363_v52 }
 0x362   :  { %v1712_v53 = vpop.eup %1711  ;;  %v533_v54 = vpop.xlane.xlu1 %532 }
 0x363   :  { %v195_v55 = vmul.f32 %v1712_v53, %v193_v50  ;;  %1715 = vrcp.f32 %v533_v54 }
 0x365   :  { %v196_v56 = vsub.f32 2.0, %v195_v55 }
 0x366   :  { %v703_v57 = vpop.xlane.xlu0 %702 }
 0x367   :  { %v197_v58 = vmul.f32 %v1712_v53, %v196_v56  ;;  %1717 = vrcp.f32 %v703_v57 }
 0x369   :  { %v1714_v59 = vpop.eup %1713  ;;  %v198_v60 = vmul.f32 %v1904_v18, %v197_v58 }
 0x36a   :  { %v365_v61 = vmul.f32 %v1714_v59, %v363_v52  ;;  %v889_v9 = vpop.xlane.xlu1 %888 }
 0x36b   :  { %1719 = vrcp.f32 %v889_v9  ;;  %1597 = vmatmul.mubr.msk.f32.vlgmr.msra.gmra.mrb[2].mxu1 %vm108_vm2, %v198_v60 }
 0x36c   :  { %v366_v62 = vsub.f32 2.0, %v365_v61  ;;  %1605 = vmatpush3.msra.mxu1 %v370_v51  ;;  %1606 = vmatprep.mubr.msk.f32.mxu1 %vm1752_vm1, %v1751_v8 }
 0x36d   :  { %v1716_v63 = vpop.eup %1715  ;;  %1614 = vmatprep.subr.mxu1 %v1751_v8 }
 0x36e   :  { %v367_v0 = vmul.f32 %v1714_v59, %v366_v62  ;;  %v535_v1 = vmul.f32 %v1716_v63, %v533_v54  ;;  %v1059_v2 = vpop.xlane.xlu0 %1058  ;;  %v1066_v23 = vpop.permute.xlu1 %1065 }
 0x36f   :  { %1721 = vrcp.f32 %v1059_v2 }
 0x370   :  { %v368_v3 = vmul.f32 %v1908_v24, %v367_v0  ;;  %v536_v4 = vsub.f32 2.0, %v535_v1 }
 0x371   :  { %v1718_v5 = vpop.eup %1717 }
 0x372   :  { %v537_v6 = vmul.f32 %v1716_v63, %v536_v4  ;;  %v705_v7 = vmul.f32 %v1718_v5, %v703_v57  ;;  %1607 = vmatmul.mubr.msk.f32.vlgmr.msra.gmra.mrb[4].mxu1 %vm108_vm2, %v368_v3  ;;  %v896_v21 = vpop.permute.xlu0 %895 }
 0x373   :  { %1615 = vmatpush3.msra.mxu1 %v540_v48  ;;  %1616 = vmatprep.mubr.msk.f32.mxu1 %vm1752_vm1, %v1751_v8 }
 0x374   :  { %v538_v11 = vmul.f32 %v1912_v29, %v537_v6  ;;  %v706_v12 = vsub.f32 2.0, %v705_v7  ;;  %1624 = vmatprep.subr.mxu1 %v1751_v8 }
 0x375   :  { %v1720_v13 = vpop.eup %1719 }
 0x376   :  { %v707_v14 = vmul.f32 %v1718_v5, %v706_v12  ;;  %v891_v15 = vmul.f32 %v1720_v13, %v889_v9  ;;  %1617 = vmatmul.mubr.msk.f32.vlgmr.msra.gmra.mrb[6].mxu1 %vm108_vm2, %v538_v11 }
 0x377   :  { %1625 = vmatpush3.msra.mxu1 %v710_v49  ;;  %1626 = vmatprep.mubr.msk.f32.mxu1 %vm1752_vm1, %v1751_v8 }
 0x378   :  { %v708_v16 = vmul.f32 %v1916_v32, %v707_v14  ;;  %v892_v17 = vsub.f32 2.0, %v891_v15  ;;  %1634 = vmatprep.subr.mxu1 %v1751_v8 }
 0x379   :  { %v1722_v18 = vpop.eup %1721 }
 0x37a   :  { %v893_v19 = vmul.f32 %v1720_v13, %v892_v17  ;;  %v1061_v20 = vmul.f32 %v1722_v18, %v1059_v2  ;;  %1627 = vmatmul.mubr.msk.f32.vlgmr.msra.gmra.mrb[8].mxu1 %vm108_vm2, %v708_v16 }
 0x37b   :  { %1635 = vmatpush3.msra.mxu1 %v896_v21  ;;  %1636 = vmatprep.mubr.msk.f32.mxu1 %vm1752_vm1, %v1751_v8 }
 0x37c   :  { %v894_v10 = vmul.f32 %v1920_v34, %v893_v19  ;;  %v1062_v22 = vsub.f32 2.0, %v1061_v20  ;;  %1644 = vmatprep.subr.mxu1 %v1751_v8 }
 0x37e   :  { %v1063_v24 = vmul.f32 %v1722_v18, %v1062_v22  ;;  %1637 = vmatmul.mubr.msk.f32.vlgmr.msra.gmra.mrb[10].mxu1 %vm108_vm2, %v894_v10 }
 0x37f   :  { %1645 = vmatpush3.msra.mxu1 %v1066_v23  ;;  %1646 = vmatprep.mubr.msk.f32.mxu1 %vm1752_vm1, %v1751_v8 }
 0x380   :  { %v1064_v25 = vmul.f32 %v1924_v36, %v1063_v24  ;;  %1654 = vmatprep.subr.mxu1 %v1751_v8 }
 0x382   :  { %1647 = vmatmul.mubr.msk.f32.vlgmr.msra.gmra.mrb[12].mxu1 %vm108_vm2, %v1064_v25 }
 0x383   :  { %1656 = vmatprep.mubr.msk.f32.mxu1 %vm1752_vm1, %v1751_v8 }
 0x39f   :  { %v1229_v26 = vpop.xlane.xlu1 %1228 }
 0x3a0   :  { %1723 = vrcp.f32 %v1229_v26 }
 0x3a3   :  { %v1399_v27 = vpop.xlane.xlu0 %1398  ;;  %v1406_v37 = vpop.permute.xlu1 %1405 }
 0x3a4   :  { %1725 = vrcp.f32 %v1399_v27 }
 0x3a7   :  { %v1236_v28 = vpop.permute.xlu0 %1235 }
 0x3a8   :  { %1655 = vmatpush3.msra.mxu1 %v1236_v28 }
 0x3a9   :  { %1664 = vmatprep.subr.mxu1 %v1751_v8 }
 0x3aa   :  { %v1724_v29 = vpop.eup %1723 }
 0x3ab   :  { %v1231_v30 = vmul.f32 %v1724_v29, %v1229_v26 }
 0x3ad   :  { %v1232_v31 = vsub.f32 2.0, %v1231_v30 }
 0x3ae   :  { %v1726_v32 = vpop.eup %1725 }
 0x3af   :  { %v1233_v33 = vmul.f32 %v1724_v29, %v1232_v31  ;;  %v1401_v34 = vmul.f32 %v1726_v32, %v1399_v27 }
 0x3b1   :  { %v1234_v35 = vmul.f32 %v1932_v44, %v1233_v33  ;;  %v1402_v36 = vsub.f32 2.0, %v1401_v34 }
 0x3b3   :  { %v1403_v38 = vmul.f32 %v1726_v32, %v1402_v36  ;;  %1657 = vmatmul.mubr.msk.f32.vlgmr.msra.gmra.mrb[14].mxu1 %vm108_vm2, %v1234_v35 }
 0x3b4   :  { %1665 = vmatpush3.msra.mxu1 %v1406_v37  ;;  %1666 = vmatprep.mubr.msk.f32.mxu1 %vm1752_vm1, %v1751_v8 }
 0x3b5   :  { %v1404_v39 = vmul.f32 %v1936_v46, %v1403_v38 }
 0x3b7   :  { %1667 = vmatmul.mubr.msk.f32.vlgmr.msra.gmra.mrb[16].mxu1 %vm108_vm2, %v1404_v39 }
 0x43e   :  { %v271_v40 = vpop.f32.mrb[2].mxu1 }
 0x43f   :  { %v1598_v41 = vpop.f32.mrb[3].mxu1 }
 0x445   :  { %v441_v42 = vpop.f32.mrb[4].mxu1 }
 0x446   :  { %786 = vrot.lane.b32.xlu0 %v441_v42, %s1764_s30  ;;  %v1608_v43 = vpop.f32.mrb[5].mxu1 }
 0x449   :  { %v611_v44 = vpop.f32.mrb[6].mxu1 }
 0x44a   :  { %790 = vrot.lane.b32.xlu1 %v611_v44, %s1765_s3  ;;  %v1618_v45 = vpop.f32.mrb[7].mxu1 }
 0x44d   :  { %v781_v47 = vpop.f32.mrb[8].mxu1 }
 0x44e   :  { %794 = vrot.lane.b32.xlu0 %v781_v47, %s1766_s4  ;;  %v1628_v48 = vpop.f32.mrb[9].mxu1 }
 0x451   :  { %v967_v8 = vpop.f32.mrb[10].mxu1 }
 0x452   :  { %v1638_v49 = vpop.f32.mrb[11].mxu1 }
 0x455   :  { %v1137_v46 = vpop.f32.mrb[12].mxu1 }
 0x456   :  { %1482 = vrot.lane.b32.xlu1 %v1137_v46, %s1764_s30  ;;  %v1648_v50 = vpop.f32.mrb[13].mxu1 }
 0x486   :  { %v1307_v51 = vpop.f32.mrb[14].mxu1 }
 0x487   :  { %1486 = vrot.lane.b32.xlu0 %v1307_v51, %s1765_s3  ;;  %v1658_v52 = vpop.f32.mrb[15].mxu1 }
 0x48a   :  { %v1477_v53 = vpop.f32.mrb[16].mxu1 }
 0x48b   :  { %1490 = vrot.lane.b32.xlu1 %v1477_v53, %s1766_s4  ;;  %v1668_v54 = vpop.f32.mrb[17].mxu1 }
 0x4b8   :  { %v787_v55 = vpop.permute.xlu0 %786 }
 0x4b9   :  { %v797_v57 = vsel %vm108_vm2, %v271_v40, %v787_v55 }
 0x4bc   :  { %v791_v56 = vpop.permute.xlu1 %790 }
 0x4bd   :  { %v799_v58 = vsel %vm798_vm4, %v797_v57, %v791_v56 }
 0x4c0   :  { %v795_v59 = vpop.permute.xlu0 %794 }
 0x4c1   :  { %v801_v60 = vsel %vm800_vm5, %v799_v58, %v795_v59 }
 0x4c2   :  { %1496 = vst.msk [vmem:[#allocation2] sm:$0xff] %vm18_vm0, %v801_v60 }
 0x4c8   :  { %v1483_v61 = vpop.permute.xlu1 %1482 }
 0x4c9   :  { %v1493_v62 = vsel %vm108_vm2, %v967_v8, %v1483_v61 }
 0x4f9   :  { %v1487_v9 = vpop.permute.xlu0 %1486 }
 0x4fa   :  { %v1494_v63 = vsel %vm798_vm4, %v1493_v62, %v1487_v9 }
 0x4fd   :  { %v1491_v0 = vpop.permute.xlu1 %1490 }
 0x4fe   :  { %v1495_v1 = vsel %vm800_vm5, %v1494_v63, %v1491_v0 }
 0x4ff   :  { %1497 = vst.msk [vmem:[#allocation2 + $0x8] sm:$0xff] %vm18_vm0, %v1495_v1 }
 0x500   :  { %1738 = shalt.err (!%p1735_p4)
}
 0x501   :  { %s1739_s10 = scalar_lea.hbm %s2001_s2, 256 }
 0x502   :  { %p1740_p5 = scmp.ne.s32.totalorder %s2001_s2, %s1739_s10  ;;  %p1743_p6 = scmp.lt.u32.totalorder %s1739_s10, %s2001_s2 }
 0x504   :  { %p1745_p7 = pnand %p1743_p6, %p1740_p5 }
 0x506   :  { %1748 = shalt.err (!%p1745_p7)
}
 0x507   :  { %s1768_s15 = smov 128  }
 0x508   :  { %1509 = dma.vmem_to_hbm [thread:$0]  %s1504_s6, 256, %s2001_s2, [#allocation3], %s1768_s15, %s1768_s15, %s1764_s30  }
 0x509   :  { %1749 = dma.done.wait [#allocation3], 256  }
 0x50a   :  { %1750 = vsyncadd [#allocation3], 4294967040 }
 0x50b   :  { %1513 = vsyncpa [#allocation3], 1 }

</bundles_post_ra>
